<compile_context>
chip_gen: v7x
topology: tpu7x:2x2x1
jax: 0.10.0
libtpu: 0.0.40
codegen_flags: <defaults>
</compile_context>

<pallas_src>
import functools

import jax
import jax.numpy as jnp
from jax import lax
from jax.experimental import pallas as pl
from jax.experimental.pallas import tpu as pltpu

LANE = 128
SUBLANE = 8
NEG_BIG = -9.0e15      # same "minus infinity" filler as the PyTorch reference
MAX_ROW_TILE = 256     # sized for v7x's 64 MiB VMEM; v5e/v6e could use 512


def _round_up(x, m):
    return (x + m - 1) // m * m


def _padded_nodes(n):
    """Padded node count: multiple of 8, and of the row tile once tiled."""
    if n <= MAX_ROW_TILE:
        return max(_round_up(n, SUBLANE), SUBLANE)
    return _round_up(n, MAX_ROW_TILE)


# ----------------------------------------------------------------------------
# Pallas kernel: one fused GAT layer (all heads), one (graph, row-block) step
# ----------------------------------------------------------------------------
def _gat_layer_kernel(x_rows_ref, x_full_ref, w_h_ref, b_h_ref, wl_ref, bl_ref,
                      wr_ref, br_ref, bias_ref, o_ref, *, num_heads, head_dim,
                      alpha, concat_heads):
    c = head_dim

    # --- exactly 3 MXU pushes, independent of num_heads ----------------------
    # 1) projected features for ALL nodes (keys/values for the aggregation).
    h_full = jnp.dot(x_full_ref[...], w_h_ref[...],
                     preferred_element_type=jnp.float32) + b_h_ref[...]
    # 2) "right" attention term for all heads & all nodes in one trans-B
    #    matmul (a_r folded into W in the wrapper): right_t[hd, j].
    right_t = lax.dot_general(
        wr_ref[...], x_full_ref[...],
        dimension_numbers=(((1,), (1,)), ((), ())),
        preferred_element_type=jnp.float32) + br_ref[...]
    # 3) "left" attention term for this row block, all heads at once.
    left = jnp.dot(x_rows_ref[...], wl_ref[...],
                   preferred_element_type=jnp.float32) + bl_ref[...]

    bias = bias_ref[...]        # 0.0 on edges, -9e15 off-edge (additive mask)

    def head_out(hd):
        logits = left[:, hd:hd + 1] + right_t[hd:hd + 1, :]        # [tm, N]
        logits = jnp.maximum(logits, alpha * logits)               # LeakyReLU
        masked = logits + bias                                     # mask (add)
        m = jnp.max(masked, axis=1, keepdims=True)
        e = jnp.exp(masked - m)
        denom = jnp.sum(e, axis=1, keepdims=True)
        probs = e * pl.reciprocal(denom, approx=True)              # EUP vrcp
        hh = h_full[:, hd * c:(hd + 1) * c]                        # [N, C]
        return jnp.dot(probs, hh, preferred_element_type=jnp.float32)

    # Zero once (covers the padded output lanes), then per-head slice stores —
    # no lane-axis concatenates / XLU relayouts.
    o_ref[...] = jnp.zeros(o_ref.shape, o_ref.dtype)
    if concat_heads:
        for hd in range(num_heads):                  # static, tiny unroll
            o_ref[:, hd * c:(hd + 1) * c] = head_out(hd).astype(o_ref.dtype)
    else:
        acc = head_out(0)
        for hd in range(1, num_heads):
            acc = acc + head_out(hd)
        o_ref[:, :c] = (acc * (1.0 / num_heads)).astype(o_ref.dtype)


# ----------------------------------------------------------------------------
# Wrapper: weight folding, padding, grid / BlockSpecs, pallas_call
# ----------------------------------------------------------------------------
def gat_layer_pallas(x, adj_bias, w, b, a, *, num_heads, concat_heads, alpha):
    """x: [B, N, Cin]; adj_bias: [B, n_pad, n_pad] additive mask (already
    padded, 0 on edges / -9e15 off-edge); w: [H*C, Cin] (PyTorch layout);
    b: [H*C]; a: [H, 2C]."""
    bsz, n, c_in = x.shape
    n_pad = adj_bias.shape[-1]
    hc = w.shape[0]
    c = hc // num_heads
    out_dim = hc if concat_heads else c

    tm = n_pad if n_pad <= MAX_ROW_TILE else MAX_ROW_TILE
    assert n_pad % tm == 0
    n_blocks = n_pad // tm
    cin_pad = max(_round_up(c_in, LANE), LANE)
    out_lanes = max(_round_up(out_dim, LANE), LANE)

    # Fold attention vectors into the projection (wrapper-side, tiny, one-off).
    a_l = a[:, :c].astype(jnp.float32)                 # [H, C]
    a_r = a[:, c:].astype(jnp.float32)                 # [H, C]
    w_t = w.T.astype(jnp.float32)                      # [Cin, H*C]
    w_t_heads = w_t.reshape(c_in, num_heads, c)
    wl = jnp.einsum("khc,hc->kh", w_t_heads, a_l)      # [Cin, H]
    wr = jnp.einsum("khc,hc->kh", w_t_heads, a_r)      # [Cin, H]
    b_heads = b.reshape(num_heads, c).astype(jnp.float32)
    bl = jnp.einsum("hc,hc->h", b_heads, a_l).reshape(1, num_heads)
    br = jnp.einsum("hc,hc->h", b_heads, a_r).reshape(num_heads, 1)

    # Zero-padded operands (padded x columns / W rows are exact no-ops).
    x_pad = jnp.zeros((bsz, n_pad, cin_pad), jnp.float32).at[:, :n, :c_in].set(x)
    w_h_pad = jnp.zeros((cin_pad, hc), jnp.float32).at[:c_in, :].set(w_t)
    b_h2 = b.reshape(1, hc).astype(jnp.float32)
    wl_pad = jnp.zeros((cin_pad, num_heads), jnp.float32).at[:c_in, :].set(wl)
    wr_pad = jnp.zeros((num_heads, cin_pad), jnp.float32).at[:, :c_in].set(wr.T)

    kernel = functools.partial(
        _gat_layer_kernel, num_heads=num_heads, head_dim=c, alpha=alpha,
        concat_heads=concat_heads)

    # Rough VMEM budget: double-buffered tiles + in-kernel [tm, N] temps.
    est = 4 * (2 * tm * n_pad + 2 * tm * cin_pad + 2 * n_pad * cin_pad
               + 2 * tm * out_lanes + n_pad * hc + 4 * tm * n_pad
               + 2 * cin_pad * (hc + 2 * num_heads))
    vmem_limit = int(min(max(2 * est, 16 * 1024 * 1024), 48 * 1024 * 1024))

    out_pad = pl.pallas_call(
        kernel,
        out_shape=jax.ShapeDtypeStruct((bsz, n_pad, out_lanes), jnp.float32),
        grid=(bsz, n_blocks),
        in_specs=[
            pl.BlockSpec((None, tm, cin_pad), lambda g, i: (g, i, 0)),     # x rows
            pl.BlockSpec((None, n_pad, cin_pad), lambda g, i: (g, 0, 0)),  # x full
            pl.BlockSpec((cin_pad, hc), lambda g, i: (0, 0)),              # W^T
            pl.BlockSpec((1, hc), lambda g, i: (0, 0)),                    # b
            pl.BlockSpec((cin_pad, num_heads), lambda g, i: (0, 0)),       # W^T a_l
            pl.BlockSpec((1, num_heads), lambda g, i: (0, 0)),             # b . a_l
            pl.BlockSpec((num_heads, cin_pad), lambda g, i: (0, 0)),       # (W^T a_r)^T
            pl.BlockSpec((num_heads, 1), lambda g, i: (0, 0)),             # b . a_r
            pl.BlockSpec((None, tm, n_pad), lambda g, i: (g, i, 0)),       # adj bias
        ],
        out_specs=pl.BlockSpec((None, tm, out_lanes), lambda g, i: (g, i, 0)),
        compiler_params=pltpu.CompilerParams(
            dimension_semantics=("parallel", "parallel"),
            vmem_limit_bytes=vmem_limit),
    )(x_pad, x_pad, w_h_pad, b_h2, wl_pad, bl, wr_pad, br, adj_bias)

    return out_pad[:, :n, :out_dim]


def _adj_bias_from_edges(edge_index, n_pad):
    """Glue: additive attention mask built directly at padded size
    (0.0 on edges, NEG_BIG elsewhere) from COO edge_index [2, E]."""
    bias = jnp.full((n_pad, n_pad), NEG_BIG, jnp.float32)
    return bias.at[edge_index[0], edge_index[1]].set(0.0)


@functools.partial(jax.jit,
                   static_argnames=("num_nodes", "num_heads", "concat_heads", "alpha"))
def gat_forward(params, node_feats, edge_index, *, num_nodes, num_heads,
                concat_heads, alpha):
    """Batched forward: node_feats [B, N, Cin], edge_index [B, 2, E]."""
    w, b, a = params
    n_pad = _padded_nodes(num_nodes)
    adj_bias = jax.vmap(lambda ei: _adj_bias_from_edges(ei, n_pad))(edge_index)
    return gat_layer_pallas(node_feats, adj_bias, w, b, a, num_heads=num_heads,
                            concat_heads=concat_heads, alpha=alpha)


# ----------------------------------------------------------------------------
# Parameter init (xavier_uniform with gain=1.414, like the PyTorch module)
# ----------------------------------------------------------------------------
def init_gat_params(key, c_in, out_channels, num_heads, concat_heads):
    if concat_heads:
        assert out_channels % num_heads == 0
        c = out_channels // num_heads
    else:
        c = out_channels
    k_w, k_b, k_a = jax.random.split(key, 3)
    gain = 1.414
    lim_w = gain * (6.0 / (c_in + c * num_heads)) ** 0.5
    w = jax.random.uniform(k_w, (c * num_heads, c_in), jnp.float32, -lim_w, lim_w)
    lim_b = 1.0 / (c_in ** 0.5)
    b = jax.random.uniform(k_b, (c * num_heads,), jnp.float32, -lim_b, lim_b)
    lim_a = gain * (6.0 / (num_heads + 2 * c)) ** 0.5
    a = jax.random.uniform(k_a, (num_heads, 2 * c), jnp.float32, -lim_a, lim_a)
    return (w, b, a)


# ----------------------------------------------------------------------------
# Pure-JAX reference (single graph) for correctness sanity check
# ----------------------------------------------------------------------------
def gat_forward_ref(params, node_feats, edge_index, num_nodes, num_heads,
                    concat_heads, alpha):
    w, b, a = params
    adj = jnp.zeros((num_nodes, num_nodes), jnp.float32)
    adj = adj.at[edge_index[0], edge_index[1]].set(1.0)
    h = node_feats @ w.T + b
    c = h.shape[1] // num_heads
    h = h.reshape(num_nodes, num_heads, c)
    a_l, a_r = a[:, :c], a[:, c:]
    left = jnp.einsum("nhc,hc->nh", h, a_l)
    right = jnp.einsum("nhc,hc->nh", h, a_r)
    logits = left[:, None, :] + right[None, :, :]          # [N, N, H]
    logits = jnp.where(logits > 0, logits, alpha * logits)
    masked = jnp.where(adj[:, :, None] > 0, logits, NEG_BIG)
    probs = jax.nn.softmax(masked, axis=1)
    out = jnp.einsum("nmh,mhc->nhc", probs, h)
    if concat_heads:
        return out.reshape(num_nodes, num_heads * c)
    return out.mean(axis=1)


if __name__ == "__main__":
    # MUTAG-like sizes: 7 node-feature channels, 16-node graphs, 2 heads,
    # 32 output channels, a small batch of graphs in ONE pallas_call.
    N_NODES = 16
    C_IN = 7
    OUT_CHANNELS = 32
    NUM_HEADS = 2
    CONCAT_HEADS = True
    ALPHA = 0.2
    BATCH = 4

    key = jax.random.PRNGKey(0)
    key, k_x, k_p = jax.random.split(key, 3)
    x = jax.random.normal(k_x, (BATCH, N_NODES, C_IN), jnp.float32)

    # Per-graph bidirectional (rotated) ring + self-loops.
    edge_lists = []
    for g in range(BATCH):
        src, dst = [], []
        for i in range(N_NODES):
            j = (i + 1 + g) % N_NODES
            src += [i, j, i]
            dst += [j, i, i]
        edge_lists.append([src, dst])
    edge_index = jnp.array(edge_lists, dtype=jnp.int32)     # [B, 2, 48]

    params = init_gat_params(k_p, C_IN, OUT_CHANNELS, NUM_HEADS, CONCAT_HEADS)

    out = gat_forward(params, x, edge_index, num_nodes=N_NODES,
                      num_heads=NUM_HEADS, concat_heads=CONCAT_HEADS, alpha=ALPHA)
    out = jax.block_until_ready(out)

    refs = jnp.stack([
        gat_forward_ref(params, x[g], edge_index[g], N_NODES, NUM_HEADS,
                        CONCAT_HEADS, ALPHA) for g in range(BATCH)])

    assert out.shape == (BATCH, N_NODES, OUT_CHANNELS)
    # approx=True reciprocal (EUP) → slightly looser tolerance than 1e-4.
    assert jnp.allclose(out, refs, atol=3e-3, rtol=3e-3), "mismatch vs reference"

    print("KERNEL_OK")
</pallas_src>

<mosaic_0001>
module attributes {stable_mosaic.version = 11 : i64} {
  func.func @_gat_layer_kernel(%arg0: i32, %arg1: i32, %arg2: memref<1x16x128xf32, #tpu.memory_space<vmem>>, %arg3: memref<1x16x128xf32, #tpu.memory_space<vmem>>, %arg4: memref<128x32xf32, #tpu.memory_space<vmem>>, %arg5: memref<1x32xf32, #tpu.memory_space<vmem>>, %arg6: memref<128x2xf32, #tpu.memory_space<vmem>>, %arg7: memref<1x2xf32, #tpu.memory_space<vmem>>, %arg8: memref<2x128xf32, #tpu.memory_space<vmem>>, %arg9: memref<2x1xf32, #tpu.memory_space<vmem>>, %arg10: memref<1x16x16xf32, #tpu.memory_space<vmem>>, %arg11: memref<1x16x128xf32, #tpu.memory_space<vmem>>) attributes {dimension_semantics = [#tpu.dimension_semantics<parallel>, #tpu.dimension_semantics<parallel>], iteration_bounds = array<i64: 4, 1>, scalar_prefetch = 0 : i64, scratch_operands = 0 : i64, tpu.core_type = #tpu.core_type<tc>, window_params = [{transform_indices = @transform_0, window_bounds = array<i64: 1, 16, 128>}, {transform_indices = @transform_1, window_bounds = array<i64: 1, 16, 128>}, {pipeline_mode = #tpu.pipeline_mode<synchronous>, transform_indices = @transform_2, window_bounds = array<i64: 128, 32>}, {pipeline_mode = #tpu.pipeline_mode<synchronous>, transform_indices = @transform_3, window_bounds = array<i64: 1, 32>}, {pipeline_mode = #tpu.pipeline_mode<synchronous>, transform_indices = @transform_4, window_bounds = array<i64: 128, 2>}, {pipeline_mode = #tpu.pipeline_mode<synchronous>, transform_indices = @transform_5, window_bounds = array<i64: 1, 2>}, {pipeline_mode = #tpu.pipeline_mode<synchronous>, transform_indices = @transform_6, window_bounds = array<i64: 2, 128>}, {pipeline_mode = #tpu.pipeline_mode<synchronous>, transform_indices = @transform_7, window_bounds = array<i64: 2, 1>}, {transform_indices = @transform_8, window_bounds = array<i64: 1, 16, 16>}, {transform_indices = @transform_9, window_bounds = array<i64: 1, 16, 128>}]} {
    %c0 = arith.constant 0 : index
    %c0_0 = arith.constant 0 : index
    %c0_1 = arith.constant 0 : index
    %0 = vector.load %arg3[%c0, %c0_0, %c0_1] : memref<1x16x128xf32, #tpu.memory_space<vmem>>, vector<1x16x128xf32>
    %1 = vector.shape_cast %0 : vector<1x16x128xf32> to vector<16x128xf32>
    %c0_2 = arith.constant 0 : index
    %c0_3 = arith.constant 0 : index
    %2 = vector.load %arg4[%c0_2, %c0_3] : memref<128x32xf32, #tpu.memory_space<vmem>>, vector<128x32xf32>
    %cst = arith.constant dense<0.000000e+00> : vector<16x32xf32>
    %3 = tpu.matmul %1, %2, %cst {dimension_numbers = #tpu.dot_dimension_numbers<[1], [0], [0], [1], [0, 0, 1, 1], [], []>} : vector<16x128xf32>, vector<128x32xf32>, vector<16x32xf32> -> vector<16x32xf32>
    %c0_4 = arith.constant 0 : index
    %c0_5 = arith.constant 0 : index
    %4 = vector.load %arg5[%c0_4, %c0_5] : memref<1x32xf32, #tpu.memory_space<vmem>>, vector<1x32xf32>
    %5 = vector.broadcast %4 : vector<1x32xf32> to vector<16x32xf32>
    %6 = arith.addf %3, %5 : vector<16x32xf32>
    %c0_6 = arith.constant 0 : index
    %c0_7 = arith.constant 0 : index
    %7 = vector.load %arg8[%c0_6, %c0_7] : memref<2x128xf32, #tpu.memory_space<vmem>>, vector<2x128xf32>
    %c0_8 = arith.constant 0 : index
    %c0_9 = arith.constant 0 : index
    %c0_10 = arith.constant 0 : index
    %8 = vector.load %arg3[%c0_8, %c0_9, %c0_10] : memref<1x16x128xf32, #tpu.memory_space<vmem>>, vector<1x16x128xf32>
    %9 = vector.shape_cast %8 : vector<1x16x128xf32> to vector<16x128xf32>
    %cst_11 = arith.constant dense<0.000000e+00> : vector<2x16xf32>
    %10 = tpu.matmul %7, %9, %cst_11 {dimension_numbers = #tpu.dot_dimension_numbers<[1], [1], [0], [0], [0, 0, 1, 0], [], []>} : vector<2x128xf32>, vector<16x128xf32>, vector<2x16xf32> -> vector<2x16xf32>
    %c0_12 = arith.constant 0 : index
    %c0_13 = arith.constant 0 : index
    %11 = vector.load %arg9[%c0_12, %c0_13] : memref<2x1xf32, #tpu.memory_space<vmem>>, vector<2x1xf32>
    %12 = vector.broadcast %11 : vector<2x1xf32> to vector<2x16xf32>
    %13 = arith.addf %10, %12 : vector<2x16xf32>
    %c0_14 = arith.constant 0 : index
    %c0_15 = arith.constant 0 : index
    %c0_16 = arith.constant 0 : index
    %14 = vector.load %arg2[%c0_14, %c0_15, %c0_16] : memref<1x16x128xf32, #tpu.memory_space<vmem>>, vector<1x16x128xf32>
    %15 = vector.shape_cast %14 : vector<1x16x128xf32> to vector<16x128xf32>
    %c0_17 = arith.constant 0 : index
    %c0_18 = arith.constant 0 : index
    %16 = vector.load %arg6[%c0_17, %c0_18] : memref<128x2xf32, #tpu.memory_space<vmem>>, vector<128x2xf32>
    %cst_19 = arith.constant dense<0.000000e+00> : vector<16x2xf32>
    %17 = tpu.matmul %15, %16, %cst_19 {dimension_numbers = #tpu.dot_dimension_numbers<[1], [0], [0], [1], [0, 0, 1, 1], [], []>} : vector<16x128xf32>, vector<128x2xf32>, vector<16x2xf32> -> vector<16x2xf32>
    %c0_20 = arith.constant 0 : index
    %c0_21 = arith.constant 0 : index
    %18 = vector.load %arg7[%c0_20, %c0_21] : memref<1x2xf32, #tpu.memory_space<vmem>>, vector<1x2xf32>
    %19 = vector.broadcast %18 : vector<1x2xf32> to vector<16x2xf32>
    %20 = arith.addf %17, %19 : vector<16x2xf32>
    %c0_22 = arith.constant 0 : index
    %c0_23 = arith.constant 0 : index
    %c0_24 = arith.constant 0 : index
    %21 = vector.load %arg10[%c0_22, %c0_23, %c0_24] : memref<1x16x16xf32, #tpu.memory_space<vmem>>, vector<1x16x16xf32>
    %22 = vector.shape_cast %21 : vector<1x16x16xf32> to vector<16x16xf32>
    %cst_25 = arith.constant 0.000000e+00 : f32
    %23 = vector.broadcast %cst_25 : f32 to vector<16x128xf32>
    %c0_26 = arith.constant 0 : index
    %c0_27 = arith.constant 0 : index
    %c0_28 = arith.constant 0 : index
    %24 = vector.load %arg11[%c0_26, %c0_27, %c0_28] : memref<1x16x128xf32, #tpu.memory_space<vmem>>, vector<1x16x128xf32>
    %25 = vector.shape_cast %24 : vector<1x16x128xf32> to vector<16x128xf32>
    %26 = vector.shape_cast %23 : vector<16x128xf32> to vector<1x16x128xf32>
    tpu.vector_store %arg11[%c0_26, %c0_27, %c0_28], %26 {strides = array<i32>} : memref<1x16x128xf32, #tpu.memory_space<vmem>>, vector<1x16x128xf32>,
    %27 = vector.extract_strided_slice %20 {offsets = [0, 0], sizes = [16, 1], strides = [1, 1]} : vector<16x2xf32> to vector<16x1xf32>
    %28 = vector.extract_strided_slice %13 {offsets = [0, 0], sizes = [1, 16], strides = [1, 1]} : vector<2x16xf32> to vector<1x16xf32>
    %29 = vector.broadcast %27 : vector<16x1xf32> to vector<16x16xf32>
    %30 = vector.broadcast %28 : vector<1x16xf32> to vector<16x16xf32>
    %31 = arith.addf %29, %30 : vector<16x16xf32>
    %cst_29 = arith.constant 2.000000e-01 : f32
    %32 = vector.broadcast %cst_29 : f32 to vector<16x16xf32>
    %33 = arith.mulf %32, %31 : vector<16x16xf32>
    %34 = arith.maximumf %31, %33 : vector<16x16xf32>
    %35 = arith.addf %34, %22 : vector<16x16xf32>
    %cst_30 = arith.constant dense<0xFF800000> : vector<16xf32>
    %36 = vector.multi_reduction <maximumf>, %35, %cst_30 [1] : vector<16x16xf32> to vector<16xf32>
    %37 = vector.shape_cast %36 : vector<16xf32> to vector<16x1xf32>
    %38 = vector.broadcast %37 : vector<16x1xf32> to vector<16x16xf32>
    %39 = arith.subf %35, %38 : vector<16x16xf32>
    %40 = math.exp %39 : vector<16x16xf32>
    %cst_31 = arith.constant dense<0.000000e+00> : vector<16xf32>
    %41 = vector.multi_reduction <add>, %40, %cst_31 [1] : vector<16x16xf32> to vector<16xf32>
    %42 = vector.shape_cast %41 : vector<16xf32> to vector<16x1xf32>
    %43 = tpu.reciprocal %42 {approx = true} : vector<16x1xf32> -> vector<16x1xf32>
    %44 = vector.broadcast %43 : vector<16x1xf32> to vector<16x16xf32>
    %45 = arith.mulf %40, %44 : vector<16x16xf32>
    %46 = vector.extract_strided_slice %6 {offsets = [0, 0], sizes = [16, 16], strides = [1, 1]} : vector<16x32xf32> to vector<16x16xf32>
    %cst_32 = arith.constant dense<0.000000e+00> : vector<16x16xf32>
    %47 = tpu.matmul %45, %46, %cst_32 {dimension_numbers = #tpu.dot_dimension_numbers<[1], [0], [0], [1], [0, 0, 1, 1], [], []>} : vector<16x16xf32>, vector<16x16xf32>, vector<16x16xf32> -> vector<16x16xf32>
    %c0_33 = arith.constant 0 : index
    %c0_34 = arith.constant 0 : index
    %c0_35 = arith.constant 0 : index
    %48 = vector.load %arg11[%c0_33, %c0_34, %c0_35] : memref<1x16x128xf32, #tpu.memory_space<vmem>>, vector<1x16x16xf32>
    %49 = vector.shape_cast %48 : vector<1x16x16xf32> to vector<16x16xf32>
    %50 = vector.shape_cast %47 : vector<16x16xf32> to vector<1x16x16xf32>
    tpu.vector_store %arg11[%c0_33, %c0_34, %c0_35], %50 {strides = array<i32>} : memref<1x16x128xf32, #tpu.memory_space<vmem>>, vector<1x16x16xf32>,
    %51 = vector.extract_strided_slice %20 {offsets = [0, 1], sizes = [16, 1], strides = [1, 1]} : vector<16x2xf32> to vector<16x1xf32>
    %52 = vector.extract_strided_slice %13 {offsets = [1, 0], sizes = [1, 16], strides = [1, 1]} : vector<2x16xf32> to vector<1x16xf32>
    %53 = vector.broadcast %51 : vector<16x1xf32> to vector<16x16xf32>
    %54 = vector.broadcast %52 : vector<1x16xf32> to vector<16x16xf32>
    %55 = arith.addf %53, %54 : vector<16x16xf32>
    %cst_36 = arith.constant 2.000000e-01 : f32
    %56 = vector.broadcast %cst_36 : f32 to vector<16x16xf32>
    %57 = arith.mulf %56, %55 : vector<16x16xf32>
    %58 = arith.maximumf %55, %57 : vector<16x16xf32>
    %59 = arith.addf %58, %22 : vector<16x16xf32>
    %cst_37 = arith.constant dense<0xFF800000> : vector<16xf32>
    %60 = vector.multi_reduction <maximumf>, %59, %cst_37 [1] : vector<16x16xf32> to vector<16xf32>
    %61 = vector.shape_cast %60 : vector<16xf32> to vector<16x1xf32>
    %62 = vector.broadcast %61 : vector<16x1xf32> to vector<16x16xf32>
    %63 = arith.subf %59, %62 : vector<16x16xf32>
    %64 = math.exp %63 : vector<16x16xf32>
    %cst_38 = arith.constant dense<0.000000e+00> : vector<16xf32>
    %65 = vector.multi_reduction <add>, %64, %cst_38 [1] : vector<16x16xf32> to vector<16xf32>
    %66 = vector.shape_cast %65 : vector<16xf32> to vector<16x1xf32>
    %67 = tpu.reciprocal %66 {approx = true} : vector<16x1xf32> -> vector<16x1xf32>
    %68 = vector.broadcast %67 : vector<16x1xf32> to vector<16x16xf32>
    %69 = arith.mulf %64, %68 : vector<16x16xf32>
    %70 = vector.extract_strided_slice %6 {offsets = [0, 16], sizes = [16, 16], strides = [1, 1]} : vector<16x32xf32> to vector<16x16xf32>
    %cst_39 = arith.constant dense<0.000000e+00> : vector<16x16xf32>
    %71 = tpu.matmul %69, %70, %cst_39 {dimension_numbers = #tpu.dot_dimension_numbers<[1], [0], [0], [1], [0, 0, 1, 1], [], []>} : vector<16x16xf32>, vector<16x16xf32>, vector<16x16xf32> -> vector<16x16xf32>
    %c0_40 = arith.constant 0 : index
    %c0_41 = arith.constant 0 : index
    %c16 = arith.constant 16 : index
    %72 = vector.load %arg11[%c0_40, %c0_41, %c16] : memref<1x16x128xf32, #tpu.memory_space<vmem>>, vector<1x16x16xf32>
    %73 = vector.shape_cast %72 : vector<1x16x16xf32> to vector<16x16xf32>
    %74 = vector.shape_cast %71 : vector<16x16xf32> to vector<1x16x16xf32>
    tpu.vector_store %arg11[%c0_40, %c0_41, %c16], %74 {strides = array<i32>} : memref<1x16x128xf32, #tpu.memory_space<vmem>>, vector<1x16x16xf32>,
    return
  }
  func.func @transform_0(%arg0: i32, %arg1: i32) -> (i32, i32, i32) {
    %c0_i32 = arith.constant 0 : i32
    %c0_i32_0 = arith.constant 0 : i32
    return %arg0, %arg1, %c0_i32 : i32, i32, i32
  }
  func.func @transform_1(%arg0: i32, %arg1: i32) -> (i32, i32, i32) {
    %c0_i32 = arith.constant 0 : i32
    %c0_i32_0 = arith.constant 0 : i32
    %c0_i32_1 = arith.constant 0 : i32
    return %arg0, %c0_i32, %c0_i32_0 : i32, i32, i32
  }
  func.func @transform_2(%arg0: i32, %arg1: i32) -> (i32, i32) {
    %c0_i32 = arith.constant 0 : i32
    %c0_i32_0 = arith.constant 0 : i32
    %c0_i32_1 = arith.constant 0 : i32
    return %c0_i32, %c0_i32_0 : i32, i32
  }
  func.func @transform_3(%arg0: i32, %arg1: i32) -> (i32, i32) {
    %c0_i32 = arith.constant 0 : i32
    %c0_i32_0 = arith.constant 0 : i32
    %c0_i32_1 = arith.constant 0 : i32
    return %c0_i32, %c0_i32_0 : i32, i32
  }
  func.func @transform_4(%arg0: i32, %arg1: i32) -> (i32, i32) {
    %c0_i32 = arith.constant 0 : i32
    %c0_i32_0 = arith.constant 0 : i32
    %c0_i32_1 = arith.constant 0 : i32
    return %c0_i32, %c0_i32_0 : i32, i32
  }
  func.func @transform_5(%arg0: i32, %arg1: i32) -> (i32, i32) {
    %c0_i32 = arith.constant 0 : i32
    %c0_i32_0 = arith.constant 0 : i32
    %c0_i32_1 = arith.constant 0 : i32
    return %c0_i32, %c0_i32_0 : i32, i32
  }
  func.func @transform_6(%arg0: i32, %arg1: i32) -> (i32, i32) {
    %c0_i32 = arith.constant 0 : i32
    %c0_i32_0 = arith.constant 0 : i32
    %c0_i32_1 = arith.constant 0 : i32
    return %c0_i32, %c0_i32_0 : i32, i32
  }
  func.func @transform_7(%arg0: i32, %arg1: i32) -> (i32, i32) {
    %c0_i32 = arith.constant 0 : i32
    %c0_i32_0 = arith.constant 0 : i32
    %c0_i32_1 = arith.constant 0 : i32
    return %c0_i32, %c0_i32_0 : i32, i32
  }
  func.func @transform_8(%arg0: i32, %arg1: i32) -> (i32, i32, i32) {
    %c0_i32 = arith.constant 0 : i32
    %c0_i32_0 = arith.constant 0 : i32
    return %arg0, %arg1, %c0_i32 : i32, i32, i32
  }
  func.func @transform_9(%arg0: i32, %arg1: i32) -> (i32, i32, i32) {
    %c0_i32 = arith.constant 0 : i32
    %c0_i32_0 = arith.constant 0 : i32
    return %arg0, %arg1, %c0_i32 : i32, i32, i32
  }
}

</mosaic_0001>

<bundles_post_ra>
// kernel: gat_forward.1
= control target key start
LH: loop header
LB: loop body
LE: loop exit
PB: predicated region body
PF: predicated region fallthrough
CT: control target
= control target key end

     0   :  { %s1832_s0 = inlined_call_operand.vmem [shape: f32[4,16,128], index: 0, kind: input, shape index: {}, may-alias: {0,1}]   ;;  %s1833_s1 = inlined_call_operand.vmem [shape: f32[4,16,128], index: 1, kind: input, shape index: {}, may-alias: {0,1}]   ;;  %s1834_s2 = inlined_call_operand.vmem [shape: f32[128,32], index: 2, kind: input, shape index: {}]   ;;  %s1835_s3 = inlined_call_operand.vmem [shape: f32[1,32], index: 3, kind: input, shape index: {}]   ;;  %s1836_s4 = inlined_call_operand.vmem [shape: f32[128,2], index: 4, kind: input, shape index: {}]   ;;  %s1837_s5 = inlined_call_operand.vmem [shape: f32[1,2], index: 5, kind: input, shape index: {}]   ;;  %s1838_s6 = inlined_call_operand.vmem [shape: f32[2,128], index: 6, kind: input, shape index: {}]   ;;  %s1839_s7 = inlined_call_operand.vmem [shape: f32[2,1], index: 7, kind: input, shape index: {}]   ;;  %s1840_s8 = inlined_call_operand.vmem [shape: f32[4,16,16], index: 8, kind: input, shape index: {}]   ;;  %s1841_s9 = inlined_call_operand.hbm [shape: f32[4,16,128], index: 9, kind: output, shape index: {}]  }
   0x1   :  { %1843 = sst [smem:[#allocation5_spill]] %s1833_s1 }
   0x2   :  { %1844 = sst [smem:[#allocation6_spill]] %s1839_s7 }
   0x3   :  { %14 = vsyncpa [#allocation3], 0 }
   0x4   :  { %16 = vsyncpa [#allocation3 + $0x1], 0  ;;  %s1563_s30 = smov 0   ;;  %s1565_s10 = smov 0  }
   0x5   :  { %s1567_s11 = smov 0   ;;  %s1569_s12 = smov 0  }
   0x6   :  { %s1571_s13 = smov 0   ;;  %s1573_s14 = smov 0  }
   0x7 LB: > { %s1094_s15 = sadd.s32 4294967295, %s1501_s14   ;;  %s1095_s16 = sadd.s32 4294967294, %s1501_s14   ;;  %s1501_s14 = sphi %s1573_s14, %s22_s14   ;;  %s1497_s13 = sphi %s1571_s13, %s1854_s13   ;;  %s1493_s12 = sphi %s1569_s12, %s1853_s12   ;;  %s1489_s11 = sphi %s1567_s11, %s1852_s11   ;;  %s1485_s10 = sphi %s1565_s10, %s1851_s10   ;;  %s1481_s30 = sphi %s1563_s30, %s1850_s30  }
   0x8   : > { %s34_s17 = sadd.s32 1, %s1497_s13  ;;  %s251_s18 = sadd.s32 1, %s1489_s11 }
   0x9   : > { %p36_p0 = scmp.ge.s32.totalorder %s34_s17, 4  ;;  %p261_p1 = scmp.ne.s32.totalorder %s1489_s11, %s1485_s10 }
   0xa   : > { %p262_p2 = scmp.eq.s32.totalorder %s1094_s15, 3  ;;  %p267_p3 = scmp.ne.s32.totalorder %s1485_s10, %s1481_s30 }
   0xb   : > { %s1856_s17 = smov (%p36_p0, %s34_s17), 0  ;;  %p268_p5 = scmp.eq.s32.totalorder %s1095_s16, 3 }
   0xc   : > { %p1603_p4 = por %p262_p2, %p261_p1  ;;  %s246_s20 = ssub.s32 %s1497_s13, %s1856_s17 }
   0xd   : > { %p1098_p6 = scmp.ge.s32.totalorder %s1501_s14, 1  ;;  %p249_p7 = scmp.eq.s32.totalorder %s246_s20, 0 }
   0xe   : > { %p1610_p8 = por %p268_p5, %p267_p3  ;;  %p338_p9 = scmp.lt.s32.totalorder %s1501_s14, 5 }
   0xf   : > { %s1616_s22 = scalar_select %p249_p7, %s1489_s11, %s251_s18  }
  0x10   : > { %p339_p10 = pnand %p1098_p6, %p338_p9 }
  0x11   : > { %p393_p11 = scmp.lt.s32.totalorder (!%p339_p10), %s1493_s12, 3  ;;  %s1842_s23 = sand.u32 (!%p339_p10), 1, %s1485_s10   ;;  %v1503_v0 = vmov (!%p339_p10), 0.0|0.0   ;;  %vm1504_vm0 = vmmov (!%p339_p10), 0   ;;  %v1505_v1 = vmov (!%p339_p10), 0.0   ;;  %v1506_v2 = vmov (!%p339_p10), 0  }
  0x12   : > { %342 = sbr.rel (%p339_p10) target bundleno = 1084 (0x43c), region = 56  ;;  %1291 = vmatprep.subr.bf16.mxu1 (!%p339_p10), %v1503_v0  ;;  %s1099_s24 = sshll.u32 (!%p339_p10), %s1842_s23, 4  ;;  %1207 = vmatprep.mubr.msk.f32.mxu1 (!%p339_p10), %vm1504_vm0, %v1505_v1  ;;  %v597_v3 = vld [vmem:[%s1836_s4] sm:$0xff] (!%p339_p10)  ;;  %v598_v4 = vld [vmem:[%s1836_s4 + $0x8] sm:$0xff] (!%p339_p10)  ;;  %v599_v10 = vld [vmem:[%s1836_s4 + $0x10] sm:$0xff] (!%p339_p10)  ;;  %vm721_vm1 = vcmask (!%p339_p10), 130048  }
  0x13   : > { %1398 = vset.pattern.permute.xlu0 (!%p339_p10), %v1506_v2  ;;  %1399 = vset.pattern.permute.xlu1 (!%p339_p10), %v1506_v2  ;;  %s1631_s16 = scalar_lea.vmem (!%p339_p10), [#allocation2], %s1099_s24  ;;  %s1847_s1 = sld [smem:[#allocation5_spill]] (!%p339_p10)  ;;  %v1294_v7 = vpack.c.bf16 (!%p339_p10), %v598_v4, %v597_v3  ;;  %v600_v11 = vld [vmem:[%s1836_s4 + $0x18] sm:$0xff] (!%p339_p10)  ;;  %v518_v12 = vld [vmem:[%s1838_s6] sm:$0x3] (!%p339_p10)  ;;  %v602_v16 = vld [vmem:[%s1836_s4 + $0x28] sm:$0xff] (!%p339_p10)  ;;  %v709_v2 = vlaneseq (!%p339_p10) }
  0x14   : > { %697 = vst [vmem:[%s1631_s16] sm:$0xff] (!%p339_p10), %v1505_v1  ;;  %698 = vst [vmem:[%s1631_s16 + $0x8] sm:$0xff] (!%p339_p10), %v1505_v1  ;;  %s1848_s7 = sld [smem:[#allocation6_spill]] (!%p339_p10)  ;;  %v1298_v13 = vpack.c.bf16 (!%p339_p10), %v600_v11, %v599_v10  ;;  %v601_v15 = vld [vmem:[%s1836_s4 + $0x20] sm:$0xff] (!%p339_p10)  ;;  %v603_v18 = vld [vmem:[%s1836_s4 + $0x30] sm:$0xff] (!%p339_p10)  ;;  %v1507_v1 = vmov (!%p339_p10), 1   ;;  %s1508_s18 = smov (!%p339_p10), 112  }
  0x15   : > { %v1302_v17 = vpack.c.bf16 (!%p339_p10), %v602_v16, %v601_v15  ;;  %v604_v19 = vld [vmem:[%s1836_s4 + $0x38] sm:$0xff] (!%p339_p10)  ;;  %v605_v21 = vld [vmem:[%s1836_s4 + $0x40] sm:$0xff] (!%p339_p10)  ;;  %v606_v22 = vld [vmem:[%s1836_s4 + $0x48] sm:$0xff] (!%p339_p10)  ;;  %v710_v3 = vshrl.u32 (!%p339_p10), %v709_v2, 7  ;;  %s1120_s26 = sshll.u32 (!%p339_p10), %s1493_s12, 8  ;;  %vm966_vm2 = vcmask (!%p339_p10), 261248  }
  0x16   : > { %v1306_v20 = vpack.c.bf16 (!%p339_p10), %v604_v19, %v603_v18  ;;  %v1310_v23 = vpack.c.bf16 (!%p339_p10), %v606_v22, %v605_v21  ;;  %v607_v24 = vld [vmem:[%s1836_s4 + $0x50] sm:$0xff] (!%p339_p10)  ;;  %v608_v25 = vld [vmem:[%s1836_s4 + $0x58] sm:$0xff] (!%p339_p10)  ;;  %v609_v27 = vld [vmem:[%s1836_s4 + $0x60] sm:$0xff] (!%p339_p10)  ;;  %s1778_s28 = scalar_lea.hbm (!%p339_p10), %s1841_s9, %s1120_s26  ;;  %s1849_s29 = sand.u32 (!%p339_p10), 1, %s1485_s10  }
  0x17   : > { %v1314_v26 = vpack.c.bf16 (!%p339_p10), %v608_v25, %v607_v24  ;;  %v610_v28 = vld [vmem:[%s1836_s4 + $0x68] sm:$0xff] (!%p339_p10)  ;;  %v611_v30 = vld [vmem:[%s1836_s4 + $0x70] sm:$0xff] (!%p339_p10)  ;;  %v612_v31 = vld [vmem:[%s1836_s4 + $0x78] sm:$0xff] (!%p339_p10) }
  0x18   : > { %v1318_v29 = vpack.c.bf16 (!%p339_p10), %v610_v28, %v609_v27  ;;  %v1322_v32 = vpack.c.bf16 (!%p339_p10), %v612_v31, %v611_v30  ;;  %v420_v34 = vld [vmem:[%s1834_s2] sm:$0xff] (!%p339_p10)  ;;  %v421_v35 = vld [vmem:[%s1834_s2 + $0x8] sm:$0xff] (!%p339_p10)  ;;  %v422_v36 = vld [vmem:[%s1834_s2 + $0x10] sm:$0xff] (!%p339_p10) }
  0x19   : > { %s394_s25 = scalar_select %p393_p11, %s1493_s12, 3  ;;  %v1259_v37 = vpack.c.bf16 %v421_v35, %v420_v34  ;;  %v423_v38 = vld [vmem:[%s1834_s2 + $0x18] sm:$0xff]  ;;  %v424_v40 = vld [vmem:[%s1834_s2 + $0x20] sm:$0xff]  ;;  %v425_v41 = vld [vmem:[%s1834_s2 + $0x28] sm:$0xff] }
  0x1a   : > { %v519_v9 = vld [vmem:[%s1848_s7] sm:$0x3]  ;;  %v1263_v39 = vpack.c.bf16 %v423_v38, %v422_v36  ;;  %v1267_v42 = vpack.c.bf16 %v425_v41, %v424_v40  ;;  %v426_v43 = vld [vmem:[%s1834_s2 + $0x30] sm:$0xff]  ;;  %v427_v44 = vld [vmem:[%s1834_s2 + $0x38] sm:$0xff] }
  0x1b   : > { %s1629_s15 = sshll.u32 %s394_s25, 4  ;;  %522 = vperm.xlu0 %1398, %v519_v9   ;;  %1260 = vmatprep.subr.bf16.mxu0 %v1259_v37  ;;  %v1271_v45 = vpack.c.bf16 %v427_v44, %v426_v43  ;;  %v428_v46 = vld [vmem:[%s1834_s2 + $0x40] sm:$0xff]  ;;  %v429_v47 = vld [vmem:[%s1834_s2 + $0x48] sm:$0xff]  ;;  %v430_v49 = vld [vmem:[%s1834_s2 + $0x50] sm:$0xff]  ;;  %v837_v9 = vsub.s32 1, %v710_v3  ;;  %s1509_s25 = smov 16  }
  0x1c   : > { %s406_s23 = scalar_lea.vmem %s1847_s1, %s1629_s15  ;;  %s1655_s20 = scalar_lea.vmem %s1832_s0, %s1629_s15  ;;  %1262 = vmatpush3.bf16.msra.mxu0 %v1259_v37  ;;  %v1275_v48 = vpack.c.bf16 %v429_v47, %v428_v46  ;;  %v431_v50 = vld [vmem:[%s1834_s2 + $0x58] sm:$0xff]  ;;  %v432_v52 = vld [vmem:[%s1834_s2 + $0x60] sm:$0xff]  ;;  %v433_v53 = vld [vmem:[%s1834_s2 + $0x68] sm:$0xff] }
  0x1d   : > { %v418_v5 = vld [vmem:[%s406_s23] sm:$0xff]  ;;  %v1639_v6 = vld [vmem:[%s406_s23 + $0x8] sm:$0xff]  ;;  %1264 = vmatprep.subr.bf16.mxu0 %v1263_v39  ;;  %v1279_v51 = vpack.c.bf16 %v431_v50, %v430_v49  ;;  %v1283_v54 = vpack.c.bf16 %v433_v53, %v432_v52  ;;  %v434_v55 = vld [vmem:[%s1834_s2 + $0x70] sm:$0xff]  ;;  %s415_s23 = scalar_lea.vmem %s1840_s8, %s1629_s15  ;;  %s1786_s1 = scalar_lea.sflag [#allocation3], %s1849_s29 }
  0x1e   : > { %v1292_v8 = vpack.c.bf16 %v1639_v6, %v418_v5  ;;  %1200 = vmatprep.mubr.f32.mxu0 %v418_v5  ;;  %v595_v14 = vld [vmem:[%s1655_s20] sm:$0xff]  ;;  %v596_v33 = vld [vmem:[%s1655_s20 + $0x8] sm:$0xff]  ;;  %v435_v56 = vld [vmem:[%s1834_s2 + $0x78] sm:$0xff]  ;;  %s985_s20 = sshll.u32 %s1631_s16, 4  ;;  %s1780_s20 = int_to_ptr.vmem [resolvable:$true] %s985_s20 }
  0x1f   : > { %v1287_v57 = vpack.c.bf16 %v435_v56, %v434_v55  ;;  %v1107_v60 = vld [vmem:[%s1837_s5] ss:$0 sm:$0xff]  ;;  %v696_v16 = vld [vmem:[%s415_s23 + $0x8] sm:$0xff]  ;;  %s1423_s12 = scalar_lea.vmem %s1780_s20, 256 }
  0x20   : > { %1293 = vmatpush3.bf16.xpose.msra.mxu1 %v1292_v8  ;;  %1266 = vmatpush3.bf16.msra.mxu0 %v1263_v39  ;;  %v695_v19 = vld [vmem:[%s415_s23] sm:$0xff]  ;;  %p1424_p12 = scmp.ne.s32.totalorder %s1780_s20, %s1423_s12  ;;  %s1510_s23 = smov [#allocation2]  }
  0x21   : > { %1295 = vmatprep.subr.bf16.mxu1 %v1294_v7  ;;  %1268 = vmatprep.subr.bf16.mxu0 %v1267_v42  ;;  %v1106_v37 = vld [vmem:[%s1835_s3] ss:$0 sm:$0xff]  ;;  %s1427_s15 = sshll.u32 %s1510_s23, 4  ;;  %s1428_s15 = int_to_ptr.vmem [resolvable:$false] %s1427_s15 }
  0x22   : > { %p1425_p13 = pnand %p1424_p12, %p1603_p4  ;;  %s1429_s7 = scalar_lea.vmem %s1428_s15, 512 }
  0x23   : > { %p1430_p1 = scmp.lt.s32.totalorder %s1780_s20, %s1428_s15  ;;  %p1431_p2 = scmp.lt.s32.totalorder %s1429_s7, %s1423_s12 }
  0x24   : > { %1270 = vmatpush3.bf16.msra.mxu0 %v1267_v42  ;;  %p1426_p0 = pneg %p1425_p13 }
  0x25   : > { %1272 = vmatprep.subr.bf16.mxu0 %v1271_v45  ;;  %p1432_p3 = por %p1431_p2, %p1430_p1 }
  0x27   : > { %1208 = vmatmul.mubr.f32.vlgmr.msra.gmra.mrb[0].mxu1 %v518_v12  ;;  %p1433_p5 = pnand %p1432_p3, %p1426_p0 }
  0x28   : > { %1297 = vmatpush3.bf16.msra.mxu1 %v1294_v7  ;;  %1242 = vmatprep.mubr.f32.mxu1 %v595_v14 }
  0x29   : > { %1299 = vmatprep.subr.bf16.mxu1 %v1298_v13  ;;  %1274 = vmatpush3.bf16.msra.mxu0 %v1271_v45 }
  0x2a   : > { %1276 = vmatprep.subr.bf16.mxu0 %v1275_v48 }
  0x2c   : > { %1301 = vmatpush3.bf16.msra.mxu1 %v1298_v13 }
  0x2d   : > { %1303 = vmatprep.subr.bf16.mxu1 %v1302_v17  ;;  %1278 = vmatpush3.bf16.msra.mxu0 %v1275_v48 }
  0x2e   : > { %1280 = vmatprep.subr.bf16.mxu0 %v1279_v51 }
  0x30   : > { %1305 = vmatpush3.bf16.msra.mxu1 %v1302_v17 }
  0x31   : > { %1307 = vmatprep.subr.bf16.mxu1 %v1306_v20  ;;  %1282 = vmatpush3.bf16.msra.mxu0 %v1279_v51 }
  0x32   : > { %1284 = vmatprep.subr.bf16.mxu0 %v1283_v54 }
  0x34   : > { %1309 = vmatpush3.bf16.msra.mxu1 %v1306_v20 }
  0x35   : > { %1311 = vmatprep.subr.bf16.mxu1 %v1310_v23  ;;  %1286 = vmatpush3.bf16.msra.mxu0 %v1283_v54 }
  0x36   : > { %1288 = vmatprep.subr.bf16.mxu0 %v1287_v57 }
  0x38   : > { %1313 = vmatpush3.bf16.msra.mxu1 %v1310_v23 }
  0x39   : > { %1315 = vmatprep.subr.bf16.mxu1 %v1314_v26  ;;  %1290 = vmatpush3.bf16.msra.mxu0 %v1287_v57 }
  0x3c   : > { %1317 = vmatpush3.bf16.msra.mxu1 %v1314_v26  ;;  %1201 = vmatmul.mubr.f32.vlgmr.msra.gmra.mrb[0].mxu0 %v1639_v6  ;;  %v711_v6 = vsub.s32 0, %v710_v3 }
  0x3d   : > { %1319 = vmatprep.subr.bf16.mxu1 %v1318_v29 }
  0x40   : > { %1321 = vmatpush3.bf16.msra.mxu1 %v1318_v29 }
  0x41   : > { %1323 = vmatprep.subr.bf16.mxu1 %v1322_v32 }
  0x44   : > { %1325 = vmatpush3.bf16.msra.mxu1 %v1322_v32 }
  0x47   : > { %1243 = vmatmul.mubr.f32.vlgmr.msra.gmra.mrb[2].mxu1 %v596_v33 }
  0x9a   : > { %v523_v4 = vpop.permute.xlu0 %522 }
  0xfa   : > { %v591_v58 = vpop.f32.mrb[0].mxu1 }
  0xfb   : > { %v1209_v59 = vpop.f32.mrb[1].mxu1  ;;  %v592_v5 = vadd.f32 %v591_v58, %v523_v4 }
  0xfd   : > { %v712_v7 = vrot.slane %v592_v5, %v711_v6  ;;  %v838_v15 = vrot.slane %v592_v5, %v837_v9 }
 0x10f   : > { %v1202_v36 = vpop.f32.mrb[0].mxu0 }
 0x110   : > { %v515_v38 = vadd.f32 %v1202_v36, %v1106_v37  ;;  %v509_v39 = vpop.f32.mrb[1].mxu0 }
 0x111   : > { %v510_v40 = vadd.f32 %v1106_v37, %v509_v39 }
 0x113   : > { %v1402_v41 = vpack.i.bf16 %v515_v38, %v510_v40  ;;  %v1326_v42 = vpack.c.bf16 %v515_v38, %v510_v40 }
 0x115   : > { %1327 = vmatprep.subr.bf16.mxu0 %v1326_v42 }
 0x116   : > { %1329 = vmatpush3.bf16.msra.mxu0 %v1326_v42 }
 0x11a   : > { %v1244_v61 = vpop.f32.mrb[2].mxu1 }
 0x11b   : > { %v692_v62 = vadd.f32 %v1244_v61, %v1107_v60  ;;  %v686_v63 = vpop.f32.mrb[3].mxu1 }
 0x11c   : > { %v687_v0 = vadd.f32 %v1107_v60, %v686_v63 }
 0x11d   : > { %706 = vperm.xlu1 %1399, %v692_v62  }
 0x11e   : > { %701 = vperm.xlu0 %1398, %v687_v0  }
 0x121   : > { %1400 = vset.pattern.permute.xlu1 %v1507_v1 }
 0x122   : > { %828 = vperm.xlu1 %1400, %v687_v0   ;;  %1401 = vset.pattern.permute.xlu0 %v1507_v1 }
 0x123   : > { %832 = vperm.xlu0 %1401, %v692_v62  }
 0x19c   : > { %v707_v8 = vpop.permute.xlu1 %706 }
 0x19d   : > { %v714_v10 = vadd.f32 %v712_v7, %v707_v8  ;;  %v702_v11 = vpop.permute.xlu0 %701 }
 0x19e   : > { %v713_v12 = vadd.f32 %v712_v7, %v702_v11 }
 0x19f   : > { %v716_v13 = vmul.f32 0.2, %v714_v10 }
 0x1a0   : > { %v715_v14 = vmul.f32 0.2, %v713_v12 }
 0x1a1   : > { %v718_v17 = vmax.f32 %v714_v10, %v716_v13  ;;  %v829_v18 = vpop.permute.xlu1 %828 }
 0x1a2   : > { %v717_v20 = vmax.f32 %v713_v12, %v715_v14  ;;  %v839_v21 = vadd.f32 %v838_v15, %v829_v18  ;;  %v833_v22 = vpop.permute.xlu0 %832 }
 0x1a3   : > { %v840_v23 = vadd.f32 %v838_v15, %v833_v22  ;;  %v720_v24 = vadd.f32 %v718_v17, %v696_v16 }
 0x1a4   : > { %v841_v25 = vmul.f32 0.2, %v839_v21  ;;  %v719_v26 = vadd.f32 %v717_v20, %v695_v19 }
 0x1a5   : > { %v842_v27 = vmul.f32 0.2, %v840_v23  ;;  %v725_v28 = vsel %vm721_vm1, %v720_v24, -inf }
 0x1a6   : > { %v843_v29 = vmax.f32 %v839_v21, %v841_v25  ;;  %726 = vmax.xlane.f32.xlu0 %v725_v28  ;;  %v722_v30 = vsel %vm721_vm1, %v719_v26, -inf }
 0x1a7   : > { %v844_v31 = vmax.f32 %v840_v23, %v842_v27  ;;  %723 = vmax.xlane.f32.xlu1 %v722_v30 }
 0x1a8   : > { %v845_v32 = vadd.f32 %v843_v29, %v695_v19 }
 0x1a9   : > { %v846_v33 = vadd.f32 %v844_v31, %v696_v16 }
 0x1aa   : > { %v847_v34 = vsel %vm721_vm1, %v845_v32, -inf }
 0x1ab   : > { %848 = vmax.xlane.f32.xlu1 %v847_v34  ;;  %v850_v35 = vsel %vm721_vm1, %v846_v33, -inf }
 0x1ac   : > { %851 = vmax.xlane.f32.xlu0 %v850_v35 }
 0x233   : > { %v727_v43 = vpop.xlane.xlu0 %726 }
 0x234   : > { %v729_v44 = vsub.f32 %v720_v24, %v727_v43  ;;  %v724_v45 = vpop.xlane.xlu1 %723 }
 0x235   : > { %v728_v46 = vsub.f32 %v719_v26, %v724_v45 }
 0x236   : > { %v732_v47 = vmul.f32 1.442695, %v729_v44 }
 0x237   : > { %v730_v48 = vmul.f32 1.442695, %v728_v46 }
 0x238   : > { %1407 = vpow2.f32 %v732_v47  ;;  %v849_v49 = vpop.xlane.xlu1 %848 }
 0x239   : > { %1409 = vpow2.f32 %v730_v48  ;;  %v853_v50 = vsub.f32 %v845_v32, %v849_v49  ;;  %v852_v51 = vpop.xlane.xlu0 %851 }
 0x23a   : > { %v854_v52 = vsub.f32 %v846_v33, %v852_v51 }
 0x23b   : > { %v855_v53 = vmul.f32 1.442695, %v853_v50 }
 0x23c   : > { %v857_v54 = vmul.f32 1.442695, %v854_v52 }
 0x23d   : > { %1411 = vpow2.f32 %v855_v53 }
 0x23e   : > { %1413 = vpow2.f32 %v857_v54 }
 0x242   : > { %v1408_v55 = vpop.eup %1407 }
 0x243   : > { %v1410_v56 = vpop.eup %1409  ;;  %v737_v57 = vsel %vm721_vm1, %v1408_v55, 0.0 }
 0x244   : > { %738 = vadd.xlane.f32.xlu0 %v737_v57  ;;  %v734_v58 = vsel %vm721_vm1, %v1410_v56, 0.0 }
 0x245   : > { %735 = vadd.xlane.f32.xlu1 %v734_v58 }
 0x247   : > { %v1412_v59 = vpop.eup %1411 }
 0x248   : > { %v1414_v60 = vpop.eup %1413  ;;  %v859_v61 = vsel %vm721_vm1, %v1412_v59, 0.0 }
 0x249   : > { %860 = vadd.xlane.f32.xlu1 %v859_v61  ;;  %v862_v62 = vsel %vm721_vm1, %v1414_v60, 0.0 }
 0x24a   : > { %863 = vadd.xlane.f32.xlu0 %v862_v62 }
 0x25a   : > { %1403 = vrot.lane.b32.xlu1 %v1402_v41, %s1508_s18 }
 0x2d1   : > { %v739_v63 = vpop.xlane.xlu0 %738 }
 0x2d2   : > { %1415 = vrcp.f32 %v739_v63  ;;  %v736_v0 = vpop.xlane.xlu1 %735 }
 0x2d3   : > { %1417 = vrcp.f32 %v736_v0 }
 0x2d6   : > { %v861_v1 = vpop.xlane.xlu1 %860 }
 0x2d7   : > { %1419 = vrcp.f32 %v861_v1  ;;  %v864_v2 = vpop.xlane.xlu0 %863 }
 0x2d8   : > { %1421 = vrcp.f32 %v864_v2 }
 0x2da   : > { %v1404_v3 = vpop.permute.xlu1 %1403 }
 0x2db   : > { %v1406_v4 = vunpack.i.h.bf16 %v1404_v3  ;;  %v1405_v5 = vunpack.i.l.bf16 %v1404_v3 }
 0x2dc   : > { %v1416_v6 = vpop.eup %1415 }
 0x2dd   : > { %v1418_v7 = vpop.eup %1417  ;;  %v1330_v8 = vpack.c.bf16 %v1406_v4, %v1405_v5  ;;  %v743_v10 = vmul.f32 %v1416_v6, %v1408_v55 }
 0x2de   : > { %v742_v9 = vmul.f32 %v1418_v7, %v1410_v56 }
 0x2df   : > { %1331 = vmatprep.subr.bf16.mxu0 %v1330_v8 }
 0x2e0   : > { %1249 = vmatprep.mubr.msk.f32.mxu0 %vm721_vm1, %v742_v9 }
 0x2e1   : > { %v1420_v11 = vpop.eup %1419  ;;  %1250 = vmatmul.mubr.msk.f32.vlgmr.msra.gmra.mrb[2].mxu0 %vm721_vm1, %v743_v10 }
 0x2e2   : > { %v1422_v12 = vpop.eup %1421  ;;  %1333 = vmatpush3.bf16.msra.mxu0 %v1330_v8  ;;  %v867_v13 = vmul.f32 %v1420_v11, %v1412_v59 }
 0x2e3   : > { %v868_v14 = vmul.f32 %v1422_v12, %v1414_v60 }
 0x2e4   : > { %1256 = vmatprep.mubr.msk.f32.mxu0 %vm721_vm1, %v867_v13 }
 0x2e5   : > { %1257 = vmatmul.mubr.msk.f32.vlgmr.msra.gmra.mrb[4].mxu0 %vm721_vm1, %v868_v14 }
 0x3b4   : > { %v1251_v15 = vpop.f32.mrb[2].mxu0 }
 0x3b5   : > { %826 = vst.msk [vmem:[%s1631_s16 + $0x8] sm:$0xff] %vm721_vm1, %v1251_v15  ;;  %v816_v16 = vpop.f32.mrb[3].mxu0 }
 0x3b6   : > { %825 = vst.msk [vmem:[%s1631_s16] sm:$0xff] %vm721_vm1, %v816_v16 }
 0x3b8   : > { %v1258_v17 = vpop.f32.mrb[4].mxu0 }
 0x3b9   : > { %962 = vrot.lane.b32.xlu1 %v1258_v17, %s1509_s25  ;;  %v949_v18 = vpop.f32.mrb[5].mxu0 }
 0x3ba   : > { %960 = vrot.lane.b32.xlu0 %v949_v18, %s1509_s25 }
 0x42b   : > { %v963_v19 = vpop.permute.xlu1 %962 }
 0x42c   : > { %968 = vst.msk [vmem:[%s1631_s16 + $0x8] sm:$0xff] %vm966_vm2, %v963_v19  ;;  %v961_v20 = vpop.permute.xlu0 %960 }
 0x42d   : > { %967 = vst.msk [vmem:[%s1631_s16] sm:$0xff] %vm966_vm2, %v961_v20 }
 0x42e   : > { %1436 = shalt.err (!%p1433_p5)
}
 0x42f   : > { %s1437_s16 = scalar_lea.hbm %s1778_s28, 256  ;;  %s1441_s26 = scalar_lea.hbm %s1841_s9, 1024 }
 0x430   : > { %p1438_p6 = scmp.ne.s32.totalorder %s1778_s28, %s1437_s16  ;;  %p1442_p10 = scmp.lt.u32.totalorder %s1778_s28, %s1841_s9 }
 0x431   : > { %p1443_p11 = scmp.lt.u32.totalorder %s1441_s26, %s1437_s16  ;;  %p1445_p13 = scmp.lt.u32.totalorder %s1437_s16, %s1778_s28 }
 0x432   : > { %p1439_p7 = pnand %p1438_p6, %p1603_p4 }
 0x433   : > { %p1444_p12 = por %p1443_p11, %p1442_p10 }
 0x434   : > { %p1440_p9 = pneg %p1439_p7 }
 0x435   : > { %p1446_p0 = por %p1445_p13, %p1444_p12 }
 0x437   : > { %p1447_p1 = pnand %p1446_p0, %p1440_p9 }
 0x439   : > { %1450 = shalt.err (!%p1447_p1)
}
 0x43a   : > { %s1511_s29 = smov 128   ;;  %s1512_s12 = smov 8  }
 0x43b   : > { %1334 = dma.vmem_to_hbm [thread:$0]  (%p1603_p4), %s1780_s20, 256, %s1778_s28, %s1786_s1, %s1511_s29, %s1511_s29, %s1512_s12  }
 0x43c PF: > { %p1340_p2 = scmp.ge.s32.totalorder %s1501_s14, 2  ;;  %s1000_s23 = sand.u32 1, %s1481_s30  }
 0x43d   : > { %s1001_s15 = scalar_lea.sflag [#allocation3], %s1000_s23 }
 0x43e   : > { %p1337_p3 = pnand %p1340_p2, %p1610_p8 }
 0x440   : > { %1476 = dma.done.wait (!%p1337_p3), %s1001_s15, 256  }
 0x441   : > { %1478 = vsyncadd (!%p1337_p3), %s1001_s15, 4294967040  ;;  %s22_s14 = sadd.s32 1, %s1501_s14   ;;  %s1850_s30 = smov %s1485_s10 }
 0x442   : > { %p19_p5 = scmp.ge.s32.totalorder %s22_s14, 6   ;;  %s1851_s10 = smov %s1489_s11 }
 0x443   : > { %s1852_s11 = smov %s1616_s22  ;;  %s1853_s12 = smov %s1497_s13 }
 0x444   : > { %s1854_s13 = smov %s1856_s17  ;;  %21 = sbr.rel (!%p19_p5) target bundleno = 7 (0x7), region = 97 }
 0x44b   :  { %1006 = vsyncpa [#allocation3], 1 }
 0x44c   :  { %1008 = vsyncpa [#allocation3 + $0x1], 1 }

</bundles_post_ra>
